<compile_context>
chip_gen: v7x
topology: tpu7x:2x2x1
jax: 0.10.0
libtpu: 0.0.40
codegen_flags: <defaults>
</compile_context>

<pallas_src>
import functools

import jax
import jax.numpy as jnp
from jax.experimental import pallas as pl
from jax.experimental.pallas import tpu as pltpu

_SUBLANE = 8  # f32 sublane tile height


def _round_up(x, m):
  return ((x + m - 1) // m) * m


def _pick_row_tile(M, tm_max):
  """Row-tile size: big tiles for bandwidth, >=2 grid steps for v7x megacore."""
  tm = min(tm_max, _round_up(M, _SUBLANE))
  if M > 256:
    # Guarantee at least 2 grid steps so the "parallel" grid axis can be
    # sharded across both TensorCores on v7x (no cost on single-TC v5e/v6e).
    tm = min(tm, _round_up(pl.cdiv(M, 2), _SUBLANE))
  return tm


def _fused_mlp_kernel(x_ref, w1_ref, b1_ref, w2_ref, b2_ref, o_ref):
  """One row-tile of: out = relu(x @ W1_eff + b1) @ W2_eff + b2 (all f32).

  x_ref:  (tm, K)          f32 input row tile (K = 784, unpadded)
  w1_ref: (K, H_pad)       f32 LoRA-folded layer-1 weight (transposed), resident
  b1_ref: (1, H_pad)       f32 bias
  w2_ref: (H_pad, N_pad)   f32 LoRA-folded layer-2 weight (transposed), resident
  b2_ref: (1, N_pad)       f32 bias
  o_ref:  (tm, N_pad)      f32 output tile (lane-dense, N padded to 128)
  """
  h = jnp.dot(x_ref[...], w1_ref[...], preferred_element_type=jnp.float32)
  h = jnp.maximum(h + b1_ref[...], 0.0)
  o = jnp.dot(h, w2_ref[...], preferred_element_type=jnp.float32)
  o_ref[...] = (o + b2_ref[...]).astype(o_ref.dtype)


def fold_and_pad_lora_params(w1, bias1, lora_a1, lora_b1,
                             w2, bias2, lora_a2, lora_b2,
                             *, lora_alpha, lora_r):
  """One-time weight prep (hoisted out of the forward path).

  Folds the LoRA delta into the frozen weight in float32:
      x @ W^T + b + s*(x@A^T)@B^T == x @ (W^T + s * A^T @ B^T) + b
  and pads the output dims to lane multiples.  K (=784) is left unpadded since
  the x BlockSpec covers the full last dim.
  """
  scaling = float(lora_alpha) / float(lora_r)
  H, K = w1.shape
  N = w2.shape[0]
  H_pad = _round_up(H, 128)
  N_pad = _round_up(N, 128)

  w1_eff_t = (w1.T.astype(jnp.float32)
              + scaling * (lora_a1.T.astype(jnp.float32)
                           @ lora_b1.T.astype(jnp.float32)))
  w2_eff_t = (w2.T.astype(jnp.float32)
              + scaling * (lora_a2.T.astype(jnp.float32)
                           @ lora_b2.T.astype(jnp.float32)))

  w1_p = jnp.zeros((K, H_pad), jnp.float32).at[:, :H].set(w1_eff_t)
  w2_p = jnp.zeros((H_pad, N_pad), jnp.float32).at[:H, :N].set(w2_eff_t)
  b1_p = jnp.zeros((1, H_pad), jnp.float32).at[0, :H].set(
      bias1.astype(jnp.float32))
  b2_p = jnp.zeros((1, N_pad), jnp.float32).at[0, :N].set(
      bias2.astype(jnp.float32))
  return w1_p, b1_p, w2_p, b2_p


def fused_lora_mlp(x2d, w1_p, b1_p, w2_p, b2_p, *, num_outputs, tm_max=512):
  """Fused two-layer LoRA MLP forward on pre-folded, pre-padded f32 weights.

  x2d: (M, K) float input rows (any float dtype, used as f32).
  Returns (M, num_outputs) float32.
  """
  M, K = x2d.shape
  Kw, H_pad = w1_p.shape
  H_pad2, N_pad = w2_p.shape
  assert K == Kw and H_pad == H_pad2

  x2d = x2d.astype(jnp.float32)
  tm = _pick_row_tile(M, tm_max)
  M_pad = _round_up(M, tm)
  if M_pad != M:
    # Only pads when the batch is not a tile multiple; no full bf16 copy.
    x2d = jnp.pad(x2d, ((0, M_pad - M), (0, 0)))

  out = pl.pallas_call(
      _fused_mlp_kernel,
      out_shape=jax.ShapeDtypeStruct((M_pad, N_pad), jnp.float32),
      grid_spec=pltpu.PrefetchScalarGridSpec(
          num_scalar_prefetch=0,
          grid=(M_pad // tm,),
          in_specs=[
              pl.BlockSpec((tm, K), lambda i: (i, 0)),         # x row tile
              pl.BlockSpec((K, H_pad), lambda i: (0, 0)),      # W1_eff^T (resident)
              pl.BlockSpec((1, H_pad), lambda i: (0, 0)),      # b1
              pl.BlockSpec((H_pad, N_pad), lambda i: (0, 0)),  # W2_eff^T (resident)
              pl.BlockSpec((1, N_pad), lambda i: (0, 0)),      # b2
          ],
          out_specs=pl.BlockSpec((tm, N_pad), lambda i: (i, 0)),
      ),
      compiler_params=pltpu.CompilerParams(
          dimension_semantics=("parallel",),
          vmem_limit_bytes=32 * 1024 * 1024),
  )(x2d, w1_p, b1_p, w2_p, b2_p)

  return out[:M, :num_outputs]


class SoftmaxNetworkLoraPallas:
  """JAX/Pallas port of softmax_network_lora (forward only)."""

  def __init__(self, num_inputs=784, num_outputs=10, num_hiddens=256,
               lora_r=4, lora_alpha=1.0, key=None, dtype=jnp.float32,
               tm_max=512):
    self.num_inputs = num_inputs
    self.num_outputs = num_outputs
    self.num_hiddens = num_hiddens
    self.lora_r = lora_r
    self.lora_alpha = lora_alpha

    if key is None:
      key = jax.random.PRNGKey(0)
    ks = jax.random.split(key, 8)

    def init(k, shape, scale):
      return (scale * jax.random.normal(k, shape)).astype(dtype)

    # linear1: LoRALinear(num_inputs -> num_hiddens)
    s1 = 1.0 / (num_inputs ** 0.5)
    self.w1 = init(ks[0], (num_hiddens, num_inputs), s1)
    self.bias1 = init(ks[1], (num_hiddens,), s1)
    self.a1 = init(ks[2], (lora_r, num_inputs), s1)
    self.lb1 = init(ks[3], (num_hiddens, lora_r), 0.1)   # nonzero: exercise LoRA path

    # linear2: LoRALinear(num_hiddens -> num_outputs)
    s2 = 1.0 / (num_hiddens ** 0.5)
    self.w2 = init(ks[4], (num_outputs, num_hiddens), s2)
    self.bias2 = init(ks[5], (num_outputs,), s2)
    self.a2 = init(ks[6], (lora_r, num_hiddens), s2)
    self.lb2 = init(ks[7], (num_outputs, lora_r), 0.1)

    # --- One-time weight prep (hoisted out of the per-call path) ---
    self.w1_p, self.b1_p, self.w2_p, self.b2_p = fold_and_pad_lora_params(
        self.w1, self.bias1, self.a1, self.lb1,
        self.w2, self.bias2, self.a2, self.lb2,
        lora_alpha=lora_alpha, lora_r=lora_r)

    self._forward = jax.jit(functools.partial(
        fused_lora_mlp, num_outputs=num_outputs, tm_max=tm_max))

  def __call__(self, x):
    x2d = x.reshape(-1, self.num_inputs)
    return self._forward(x2d, self.w1_p, self.b1_p, self.w2_p, self.b2_p)

  def reference(self, x):
    """Pure-JAX f32 reference using the explicit (un-folded) LoRA formula."""
    scale = self.lora_alpha / self.lora_r
    x2d = x.reshape(-1, self.num_inputs).astype(jnp.float32)
    h = x2d @ self.w1.T + self.bias1 + scale * (x2d @ self.a1.T) @ self.lb1.T
    h = jnp.maximum(h, 0.0)
    return h @ self.w2.T + self.bias2 + scale * (h @ self.a2.T) @ self.lb2.T


if __name__ == "__main__":
  key = jax.random.PRNGKey(0)
  k_x, k_params = jax.random.split(key)

  # Small MNIST-like input: batch=8, NCHW (8, 1, 28, 28) -> (8, 784).
  x = jax.random.normal(k_x, (8, 1, 28, 28), dtype=jnp.float32)

  model = SoftmaxNetworkLoraPallas(num_inputs=784, num_outputs=10,
                                   num_hiddens=256, lora_r=4, lora_alpha=1.0,
                                   key=k_params)

  out = jax.block_until_ready(model(x))
  assert out.shape == (8, 10), out.shape

  # Kernel keeps the LoRA fold and all matmuls in f32, so it should track the
  # un-folded f32 reference closely; the tolerance only hedges against MXU
  # multi-pass rounding differences between the kernel and the XLA reference.
  ref = model.reference(x)
  max_err = float(jnp.max(jnp.abs(out - ref)))
  assert jnp.allclose(out, ref, atol=2e-2, rtol=2e-2), (
      f"mismatch vs f32 reference, max abs err = {max_err}")

  print("KERNEL_OK")
</pallas_src>

<mosaic_0001>
module attributes {stable_mosaic.version = 11 : i64} {
  func.func @_fused_mlp_kernel(%arg0: i32, %arg1: memref<8x784xf32, #tpu.memory_space<vmem>>, %arg2: memref<784x256xf32, #tpu.memory_space<vmem>>, %arg3: memref<1x256xf32, #tpu.memory_space<vmem>>, %arg4: memref<256x128xf32, #tpu.memory_space<vmem>>, %arg5: memref<1x128xf32, #tpu.memory_space<vmem>>, %arg6: memref<8x128xf32, #tpu.memory_space<vmem>>) attributes {dimension_semantics = [#tpu.dimension_semantics<parallel>], iteration_bounds = array<i64: 1>, scalar_prefetch = 0 : i64, scratch_operands = 0 : i64, tpu.core_type = #tpu.core_type<tc>, window_params = [{transform_indices = @transform_0, window_bounds = array<i64: 8, 784>}, {pipeline_mode = #tpu.pipeline_mode<synchronous>, transform_indices = @transform_1, window_bounds = array<i64: 784, 256>}, {pipeline_mode = #tpu.pipeline_mode<synchronous>, transform_indices = @transform_2, window_bounds = array<i64: 1, 256>}, {pipeline_mode = #tpu.pipeline_mode<synchronous>, transform_indices = @transform_3, window_bounds = array<i64: 256, 128>}, {pipeline_mode = #tpu.pipeline_mode<synchronous>, transform_indices = @transform_4, window_bounds = array<i64: 1, 128>}, {transform_indices = @transform_5, window_bounds = array<i64: 8, 128>}]} {
    %c0 = arith.constant 0 : index
    %c0_0 = arith.constant 0 : index
    %0 = vector.load %arg1[%c0, %c0_0] : memref<8x784xf32, #tpu.memory_space<vmem>>, vector<8x784xf32>
    %c0_1 = arith.constant 0 : index
    %c0_2 = arith.constant 0 : index
    %1 = vector.load %arg2[%c0_1, %c0_2] : memref<784x256xf32, #tpu.memory_space<vmem>>, vector<784x256xf32>
    %cst = arith.constant dense<0.000000e+00> : vector<8x256xf32>
    %2 = tpu.matmul %0, %1, %cst {dimension_numbers = #tpu.dot_dimension_numbers<[1], [0], [0], [1], [0, 0, 1, 1], [], []>} : vector<8x784xf32>, vector<784x256xf32>, vector<8x256xf32> -> vector<8x256xf32>
    %c0_3 = arith.constant 0 : index
    %c0_4 = arith.constant 0 : index
    %3 = vector.load %arg3[%c0_3, %c0_4] : memref<1x256xf32, #tpu.memory_space<vmem>>, vector<1x256xf32>
    %4 = vector.broadcast %3 : vector<1x256xf32> to vector<8x256xf32>
    %5 = arith.addf %2, %4 : vector<8x256xf32>
    %cst_5 = arith.constant 0.000000e+00 : f32
    %6 = vector.broadcast %cst_5 : f32 to vector<8x256xf32>
    %7 = arith.maximumf %5, %6 : vector<8x256xf32>
    %c0_6 = arith.constant 0 : index
    %c0_7 = arith.constant 0 : index
    %8 = vector.load %arg4[%c0_6, %c0_7] : memref<256x128xf32, #tpu.memory_space<vmem>>, vector<256x128xf32>
    %cst_8 = arith.constant dense<0.000000e+00> : vector<8x128xf32>
    %9 = tpu.matmul %7, %8, %cst_8 {dimension_numbers = #tpu.dot_dimension_numbers<[1], [0], [0], [1], [0, 0, 1, 1], [], []>} : vector<8x256xf32>, vector<256x128xf32>, vector<8x128xf32> -> vector<8x128xf32>
    %c0_9 = arith.constant 0 : index
    %c0_10 = arith.constant 0 : index
    %10 = vector.load %arg5[%c0_9, %c0_10] : memref<1x128xf32, #tpu.memory_space<vmem>>, vector<1x128xf32>
    %11 = vector.broadcast %10 : vector<1x128xf32> to vector<8x128xf32>
    %12 = arith.addf %9, %11 : vector<8x128xf32>
    %c0_11 = arith.constant 0 : index
    %c0_12 = arith.constant 0 : index
    %13 = vector.load %arg6[%c0_11, %c0_12] : memref<8x128xf32, #tpu.memory_space<vmem>>, vector<8x128xf32>
    tpu.vector_store %arg6[%c0_11, %c0_12], %12 {strides = array<i32>} : memref<8x128xf32, #tpu.memory_space<vmem>>, vector<8x128xf32>,
    return
  }
  func.func @transform_0(%arg0: i32) -> (i32, i32) {
    %c0_i32 = arith.constant 0 : i32
    %c0_i32_0 = arith.constant 0 : i32
    return %arg0, %c0_i32 : i32, i32
  }
  func.func @transform_1(%arg0: i32) -> (i32, i32) {
    %c0_i32 = arith.constant 0 : i32
    %c0_i32_0 = arith.constant 0 : i32
    %c0_i32_1 = arith.constant 0 : i32
    return %c0_i32, %c0_i32_0 : i32, i32
  }
  func.func @transform_2(%arg0: i32) -> (i32, i32) {
    %c0_i32 = arith.constant 0 : i32
    %c0_i32_0 = arith.constant 0 : i32
    %c0_i32_1 = arith.constant 0 : i32
    return %c0_i32, %c0_i32_0 : i32, i32
  }
  func.func @transform_3(%arg0: i32) -> (i32, i32) {
    %c0_i32 = arith.constant 0 : i32
    %c0_i32_0 = arith.constant 0 : i32
    %c0_i32_1 = arith.constant 0 : i32
    return %c0_i32, %c0_i32_0 : i32, i32
  }
  func.func @transform_4(%arg0: i32) -> (i32, i32) {
    %c0_i32 = arith.constant 0 : i32
    %c0_i32_0 = arith.constant 0 : i32
    %c0_i32_1 = arith.constant 0 : i32
    return %c0_i32, %c0_i32_0 : i32, i32
  }
  func.func @transform_5(%arg0: i32) -> (i32, i32) {
    %c0_i32 = arith.constant 0 : i32
    %c0_i32_0 = arith.constant 0 : i32
    return %arg0, %c0_i32 : i32, i32
  }
}

</mosaic_0001>

<bundles_post_ra>
// kernel: fused_lora_mlp.1
= control target key start
LH: loop header
LB: loop body
LE: loop exit
PB: predicated region body
PF: predicated region fallthrough
CT: control target
= control target key end

     0   :  { %10 = vsyncpa [#allocation3], 0  ;;  %s1160_s0 = inlined_call_operand.hbm [shape: f32[8,784], index: 0, kind: input, shape index: {}]   ;;  %s1161_s1 = inlined_call_operand.hbm [shape: f32[784,256], index: 1, kind: input, shape index: {}]   ;;  %s1162_s2 = inlined_call_operand.vmem [shape: f32[1,256], index: 2, kind: input, shape index: {}]   ;;  %s1163_s3 = inlined_call_operand.hbm [shape: f32[256,128], index: 3, kind: input, shape index: {}]   ;;  %s1164_s4 = inlined_call_operand.vmem [shape: f32[1,128], index: 4, kind: input, shape index: {}]   ;;  %s1165_s5 = inlined_call_operand.hbm [shape: f32[8,128], index: 5, kind: output, shape index: {}]  }
   0x1   :  { %11 = vsyncpa [#allocation6], 0 }
   0x2   :  { %12 = vsyncpa [#allocation4], 0  ;;  %s1067_s18 = smov [#allocation5]   ;;  %s973_s22 = scalar_lea.hbm %s1161_s1, 25088 }
   0x3   :  { %s28_s19 = sshll.u32 %s1067_s18, 4  ;;  %p974_p0 = scmp.ne.s32.totalorder %s1161_s1, %s973_s22  ;;  %s29_s19 = int_to_ptr.vmem [resolvable:$true] %s28_s19 }
   0x4   :  { %p977_p1 = scmp.lt.u32.totalorder %s973_s22, %s1161_s1 }
   0x6   :  { %p979_p2 = pnand %p977_p1, %p974_p0 }
   0x8   :  { %982 = shalt.err (!%p979_p2)
}
   0x9   :  { %s983_s27 = scalar_lea.vmem %s29_s19, 25088  ;;  %p988_p4 = scmp.lt.s32.totalorder %s29_s19, %s29_s19 }
   0xa   :  { %p984_p3 = scmp.ne.s32.totalorder %s29_s19, %s983_s27  ;;  %p989_p5 = scmp.lt.s32.totalorder %s983_s27, %s983_s27 }
   0xc   :  { %p990_p6 = por %p989_p5, %p988_p4 }
   0xe   :  { %p991_p7 = pnand %p990_p6, %p984_p3 }
  0x10   :  { %994 = shalt.err (!%p991_p7)
}
  0x11   :  { %s1068_s28 = smov 256   ;;  %s1069_s29 = smov 16  }
  0x12   :  { %34 = dma.hbm_to_vmem [thread:$0]  %s1161_s1, 25088, %s29_s19, [#allocation6], %s1068_s28, %s1068_s28, %s1069_s29  }
  0x13   :  { %s1070_s7 = smov [#allocation2]   ;;  %s1071_s9 = smov [#allocation7]  }
  0x14   :  { %s19_s8 = sshll.u32 %s1070_s7, 4  ;;  %s42_s10 = sshll.u32 %s1071_s9, 4  ;;  %s20_s8 = int_to_ptr.vmem [resolvable:$true] %s19_s8  ;;  %s43_s10 = int_to_ptr.vmem [resolvable:$true] %s42_s10 }
  0x15   :  { %s995_s13 = scalar_lea.hbm %s1160_s0, 896 }
  0x16   :  { %p996_p8 = scmp.ne.s32.totalorder %s1160_s0, %s995_s13  ;;  %p999_p9 = scmp.lt.u32.totalorder %s995_s13, %s1160_s0 }
  0x18   :  { %p1001_p10 = pnand %p999_p9, %p996_p8 }
  0x1a   :  { %1004 = shalt.err (!%p1001_p10)
}
  0x1b   :  { %s1005_s1 = scalar_lea.vmem %s20_s8, 896  ;;  %p1010_p12 = scmp.lt.s32.totalorder %s20_s8, %s20_s8 }
  0x1c   :  { %p1006_p11 = scmp.ne.s32.totalorder %s20_s8, %s1005_s1  ;;  %p1011_p13 = scmp.lt.s32.totalorder %s1005_s1, %s1005_s1 }
  0x1e   :  { %p1012_p0 = por %p1011_p13, %p1010_p12 }
  0x20   :  { %p1013_p1 = pnand %p1012_p0, %p1006_p11 }
  0x22   :  { %1016 = shalt.err (!%p1013_p1)
}
  0x23   :  { %22 = dma.hbm_to_vmem [thread:$0]  %s1160_s0, 896, %s20_s8, [#allocation3]  }
  0x24   :  { %s1017_s22 = scalar_lea.hbm %s1163_s3, 4096 }
  0x25   :  { %p1018_p2 = scmp.ne.s32.totalorder %s1163_s3, %s1017_s22  ;;  %p1021_p3 = scmp.lt.u32.totalorder %s1017_s22, %s1163_s3 }
  0x27   :  { %p1023_p4 = pnand %p1021_p3, %p1018_p2 }
  0x29   :  { %1026 = shalt.err (!%p1023_p4)
}
  0x2a   :  { %s1027_s27 = scalar_lea.vmem %s43_s10, 4096  ;;  %p1032_p6 = scmp.lt.s32.totalorder %s43_s10, %s43_s10 }
  0x2b   :  { %p1028_p5 = scmp.ne.s32.totalorder %s43_s10, %s1027_s27  ;;  %p1033_p7 = scmp.lt.s32.totalorder %s1027_s27, %s1027_s27 }
  0x2d   :  { %p1034_p8 = por %p1033_p7, %p1032_p6 }
  0x2f   :  { %p1035_p9 = pnand %p1034_p8, %p1028_p5 }
  0x31   :  { %1038 = shalt.err (!%p1035_p9)
}
  0x32   :  { %s1072_s0 = smov 128   ;;  %s1073_s28 = smov 8  }
  0x33   :  { %48 = dma.hbm_to_vmem [thread:$0]  %s1163_s3, 4096, %s43_s10, [#allocation6], %s1072_s0, %s1072_s0, %s1073_s28  }
  0x34   :  { %1061 = dma.done.wait [#allocation3], 896  }
  0x35   :  { %1062 = vsyncadd [#allocation3], 4294966400 }
  0x36   :  { %1063 = dma.done.wait [#allocation6], 29184  }
  0x37   :  { %1064 = vsyncadd [#allocation6], 4294938112  ;;  %v132_v0 = vld [vmem:[#allocation5 + $0x208] sm:$0xff]  ;;  %v134_v1 = vld [vmem:[#allocation5 + $0x218] sm:$0xff]  ;;  %vm275_vm0 = vcmask 130048  }
  0x38   :  { %v131_v2 = vld [vmem:[#allocation5 + $0x200] sm:$0xff]  ;;  %v792_v3 = vpack.c.bf16 %v134_v1, %v132_v0  ;;  %v133_v4 = vld [vmem:[#allocation5 + $0x210] sm:$0xff]  ;;  %v136_v5 = vld [vmem:[#allocation5 + $0x228] sm:$0xff] }
  0x39   :  { %v138_v6 = vld [vmem:[#allocation5 + $0x238] sm:$0xff]  ;;  %v794_v7 = vpack.c.bf16 %v133_v4, %v131_v2  ;;  %v135_v9 = vld [vmem:[#allocation5 + $0x220] sm:$0xff]  ;;  %v137_v10 = vld [vmem:[#allocation5 + $0x230] sm:$0xff] }
  0x3a   :  { %v796_v8 = vpack.c.bf16 %v138_v6, %v136_v5  ;;  %v140_v11 = vld [vmem:[#allocation5 + $0x248] sm:$0xff]  ;;  %793 = vmatprep.subr.bf16.mxu0 %v792_v3  ;;  %v142_v12 = vld [vmem:[#allocation5 + $0x258] sm:$0xff]  ;;  %v798_v13 = vpack.c.bf16 %v137_v10, %v135_v9  ;;  %v139_v15 = vld [vmem:[#allocation5 + $0x240] sm:$0xff] }
  0x3b   :  { %795 = vmatpush1.bf16.msra.mxu0 %v794_v7  ;;  %v800_v14 = vpack.c.bf16 %v142_v12, %v140_v11  ;;  %v141_v16 = vld [vmem:[#allocation5 + $0x250] sm:$0xff]  ;;  %v144_v17 = vld [vmem:[#allocation5 + $0x268] sm:$0xff]  ;;  %v146_v18 = vld [vmem:[#allocation5 + $0x278] sm:$0xff] }
  0x3c   :  { %797 = vmatprep.subr.bf16.mxu0 %v796_v8  ;;  %v802_v19 = vpack.c.bf16 %v141_v16, %v139_v15  ;;  %v804_v20 = vpack.c.bf16 %v146_v18, %v144_v17  ;;  %v143_v21 = vld [vmem:[#allocation5 + $0x260] sm:$0xff]  ;;  %v145_v22 = vld [vmem:[#allocation5 + $0x270] sm:$0xff]  ;;  %v148_v23 = vld [vmem:[#allocation5 + $0x288] sm:$0xff] }
  0x3d   :  { %v150_v24 = vld [vmem:[#allocation5 + $0x298] sm:$0xff]  ;;  %v806_v25 = vpack.c.bf16 %v145_v22, %v143_v21  ;;  %v147_v27 = vld [vmem:[#allocation5 + $0x280] sm:$0xff]  ;;  %v149_v28 = vld [vmem:[#allocation5 + $0x290] sm:$0xff] }
  0x3e   :  { %v808_v26 = vpack.c.bf16 %v150_v24, %v148_v23  ;;  %v152_v29 = vld [vmem:[#allocation5 + $0x2a8] sm:$0xff]  ;;  %v154_v30 = vld [vmem:[#allocation5 + $0x2b8] sm:$0xff]  ;;  %v810_v31 = vpack.c.bf16 %v149_v28, %v147_v27  ;;  %v151_v33 = vld [vmem:[#allocation5 + $0x2a0] sm:$0xff] }
  0x3f   :  { %799 = vmatpush1.bf16.msra.mxu0 %v798_v13  ;;  %v812_v32 = vpack.c.bf16 %v154_v30, %v152_v29  ;;  %v153_v34 = vld [vmem:[#allocation5 + $0x2b0] sm:$0xff]  ;;  %v156_v35 = vld [vmem:[#allocation5 + $0x2c8] sm:$0xff]  ;;  %v158_v36 = vld [vmem:[#allocation5 + $0x2d8] sm:$0xff] }
  0x40   :  { %801 = vmatprep.subr.bf16.mxu0 %v800_v14  ;;  %v814_v37 = vpack.c.bf16 %v153_v34, %v151_v33  ;;  %v155_v38 = vld [vmem:[#allocation5 + $0x2c0] sm:$0xff]  ;;  %v157_v39 = vld [vmem:[#allocation5 + $0x2d0] sm:$0xff]  ;;  %v68_v40 = vld [vmem:[#allocation5 + $0x8] sm:$0xff]  ;;  %v816_v41 = vpack.c.bf16 %v158_v36, %v156_v35 }
  0x41   :  { %v160_v42 = vld [vmem:[#allocation5 + $0x2e8] sm:$0xff]  ;;  %v162_v43 = vld [vmem:[#allocation5 + $0x2f8] sm:$0xff]  ;;  %v67_v46 = vld [vmem:[#allocation5] sm:$0xff]  ;;  %v818_v51 = vpack.c.bf16 %v157_v39, %v155_v38 }
  0x42   :  { %v70_v44 = vld [vmem:[#allocation5 + $0x18] sm:$0xff]  ;;  %v69_v47 = vld [vmem:[#allocation5 + $0x10] sm:$0xff]  ;;  %v63_v48 = vld [vmem:[#allocation2 + $0x18] sm:$0xff]  ;;  %v820_v54 = vpack.c.bf16 %v162_v43, %v160_v42 }
  0x43   :  { %803 = vmatpush1.bf16.msra.mxu0 %v802_v19  ;;  %v728_v45 = vpack.c.bf16 %v70_v44, %v68_v40  ;;  %v730_v49 = vpack.c.bf16 %v69_v47, %v67_v46  ;;  %414 = vmatprep.mubr.f32.mxu0 %v63_v48  ;;  %v72_v50 = vld [vmem:[#allocation5 + $0x28] sm:$0xff]  ;;  %v159_v52 = vld [vmem:[#allocation5 + $0x2e0] sm:$0xff]  ;;  %v74_v53 = vld [vmem:[#allocation5 + $0x38] sm:$0xff] }
  0x44   :  { %805 = vmatprep.subr.bf16.mxu0 %v804_v20  ;;  %v161_v55 = vld [vmem:[#allocation5 + $0x2f0] sm:$0xff]  ;;  %v732_v56 = vpack.c.bf16 %v74_v53, %v72_v50  ;;  %v71_v57 = vld [vmem:[#allocation5 + $0x20] sm:$0xff]  ;;  %v164_v59 = vld [vmem:[#allocation5 + $0x308] sm:$0xff] }
  0x45   :  { %729 = vmatprep.subr.bf16.mxu1 %v728_v45  ;;  %v73_v58 = vld [vmem:[#allocation5 + $0x30] sm:$0xff]  ;;  %v166_v60 = vld [vmem:[#allocation5 + $0x318] sm:$0xff]  ;;  %v76_v62 = vld [vmem:[#allocation5 + $0x48] sm:$0xff]  ;;  %v822_v0 = vpack.c.bf16 %v161_v55, %v159_v52 }
  0x46   :  { %731 = vmatpush1.bf16.msra.mxu1 %v730_v49  ;;  %v734_v61 = vpack.c.bf16 %v73_v58, %v71_v57  ;;  %v78_v63 = vld [vmem:[#allocation5 + $0x58] sm:$0xff]  ;;  %v163_v1 = vld [vmem:[#allocation5 + $0x300] sm:$0xff]  ;;  %v77_v4 = vld [vmem:[#allocation5 + $0x50] sm:$0xff]  ;;  %v824_v5 = vpack.c.bf16 %v166_v60, %v164_v59 }
  0x47   :  { %807 = vmatpush1.bf16.msra.mxu0 %v806_v25  ;;  %733 = vmatprep.subr.bf16.mxu1 %v732_v56  ;;  %v736_v2 = vpack.c.bf16 %v78_v63, %v76_v62  ;;  %v75_v3 = vld [vmem:[#allocation5 + $0x40] sm:$0xff]  ;;  %v165_v6 = vld [vmem:[#allocation5 + $0x310] sm:$0xff]  ;;  %v80_v8 = vld [vmem:[#allocation5 + $0x68] sm:$0xff] }
  0x48   :  { %809 = vmatprep.subr.bf16.mxu0 %v808_v26  ;;  %v738_v7 = vpack.c.bf16 %v77_v4, %v75_v3  ;;  %v82_v9 = vld [vmem:[#allocation5 + $0x78] sm:$0xff]  ;;  %v168_v10 = vld [vmem:[#allocation5 + $0x328] sm:$0xff]  ;;  %v79_v13 = vld [vmem:[#allocation5 + $0x60] sm:$0xff]  ;;  %v826_v15 = vpack.c.bf16 %v165_v6, %v163_v1 }
  0x49   :  { %v170_v11 = vld [vmem:[#allocation5 + $0x338] sm:$0xff]  ;;  %v740_v12 = vpack.c.bf16 %v82_v9, %v80_v8  ;;  %v81_v14 = vld [vmem:[#allocation5 + $0x70] sm:$0xff]  ;;  %v84_v16 = vld [vmem:[#allocation5 + $0x88] sm:$0xff] }
  0x4a   :  { %735 = vmatpush1.bf16.msra.mxu1 %v734_v61  ;;  %v86_v17 = vld [vmem:[#allocation5 + $0x98] sm:$0xff]  ;;  %v828_v18 = vpack.c.bf16 %v170_v11, %v168_v10  ;;  %v167_v19 = vld [vmem:[#allocation5 + $0x320] sm:$0xff]  ;;  %v169_v20 = vld [vmem:[#allocation5 + $0x330] sm:$0xff]  ;;  %v742_v22 = vpack.c.bf16 %v81_v14, %v79_v13 }
  0x4b   :  { %811 = vmatpush1.bf16.msra.mxu0 %v810_v31  ;;  %737 = vmatprep.subr.bf16.mxu1 %v736_v2  ;;  %v172_v21 = vld [vmem:[#allocation5 + $0x348] sm:$0xff]  ;;  %v174_v23 = vld [vmem:[#allocation5 + $0x358] sm:$0xff]  ;;  %v744_v24 = vpack.c.bf16 %v86_v17, %v84_v16  ;;  %v83_v25 = vld [vmem:[#allocation5 + $0x80] sm:$0xff]  ;;  %v830_v29 = vpack.c.bf16 %v169_v20, %v167_v19 }
  0x4c   :  { %813 = vmatprep.subr.bf16.mxu0 %v812_v32  ;;  %v85_v26 = vld [vmem:[#allocation5 + $0x90] sm:$0xff]  ;;  %v88_v27 = vld [vmem:[#allocation5 + $0xa8] sm:$0xff]  ;;  %v90_v28 = vld [vmem:[#allocation5 + $0xb8] sm:$0xff]  ;;  %v832_v30 = vpack.c.bf16 %v174_v23, %v172_v21 }
  0x4d   :  { %v171_v31 = vld [vmem:[#allocation5 + $0x340] sm:$0xff]  ;;  %v173_v32 = vld [vmem:[#allocation5 + $0x350] sm:$0xff]  ;;  %v176_v33 = vld [vmem:[#allocation5 + $0x368] sm:$0xff]  ;;  %v746_v34 = vpack.c.bf16 %v85_v26, %v83_v25  ;;  %v748_v36 = vpack.c.bf16 %v90_v28, %v88_v27 }
  0x4e   :  { %739 = vmatpush1.bf16.msra.mxu1 %v738_v7  ;;  %v178_v35 = vld [vmem:[#allocation5 + $0x378] sm:$0xff]  ;;  %v89_v38 = vld [vmem:[#allocation5 + $0xb0] sm:$0xff]  ;;  %v92_v39 = vld [vmem:[#allocation5 + $0xc8] sm:$0xff] }
  0x4f   :  { %815 = vmatpush1.bf16.msra.mxu0 %v814_v37  ;;  %741 = vmatprep.subr.bf16.mxu1 %v740_v12  ;;  %v87_v37 = vld [vmem:[#allocation5 + $0xa0] sm:$0xff]  ;;  %v94_v40 = vld [vmem:[#allocation5 + $0xd8] sm:$0xff]  ;;  %v836_v42 = vpack.c.bf16 %v178_v35, %v176_v33  ;;  %v177_v44 = vld [vmem:[#allocation5 + $0x370] sm:$0xff] }
  0x50   :  { %817 = vmatprep.subr.bf16.mxu0 %v816_v41  ;;  %v834_v41 = vpack.c.bf16 %v173_v32, %v171_v31  ;;  %v175_v43 = vld [vmem:[#allocation5 + $0x360] sm:$0xff]  ;;  %v180_v45 = vld [vmem:[#allocation5 + $0x388] sm:$0xff]  ;;  %v750_v46 = vpack.c.bf16 %v89_v38, %v87_v37  ;;  %v182_v47 = vld [vmem:[#allocation5 + $0x398] sm:$0xff]  ;;  %v752_v48 = vpack.c.bf16 %v94_v40, %v92_v39 }
  0x51   :  { %v91_v49 = vld [vmem:[#allocation5 + $0xc0] sm:$0xff]  ;;  %v93_v50 = vld [vmem:[#allocation5 + $0xd0] sm:$0xff]  ;;  %v98_v52 = vld [vmem:[#allocation5 + $0xf8] sm:$0xff]  ;;  %v838_v53 = vpack.c.bf16 %v177_v44, %v175_v43 }
  0x52   :  { %743 = vmatpush1.bf16.msra.mxu1 %v742_v22  ;;  %v179_v55 = vld [vmem:[#allocation5 + $0x380] sm:$0xff]  ;;  %v181_v56 = vld [vmem:[#allocation5 + $0x390] sm:$0xff]  ;;  %v184_v57 = vld [vmem:[#allocation5 + $0x3a8] sm:$0xff]  ;;  %v754_v58 = vpack.c.bf16 %v93_v50, %v91_v49 }
  0x53   :  { %819 = vmatpush1.bf16.msra.mxu0 %v818_v51  ;;  %745 = vmatprep.subr.bf16.mxu1 %v744_v24  ;;  %v96_v51 = vld [vmem:[#allocation5 + $0xe8] sm:$0xff]  ;;  %v186_v59 = vld [vmem:[#allocation5 + $0x3b8] sm:$0xff]  ;;  %v95_v61 = vld [vmem:[#allocation5 + $0xe0] sm:$0xff]  ;;  %v842_v1 = vpack.c.bf16 %v181_v56, %v179_v55 }
  0x54   :  { %821 = vmatprep.subr.bf16.mxu0 %v820_v54  ;;  %v840_v54 = vpack.c.bf16 %v182_v47, %v180_v45  ;;  %v756_v60 = vpack.c.bf16 %v98_v52, %v96_v51  ;;  %v97_v62 = vld [vmem:[#allocation5 + $0xf0] sm:$0xff]  ;;  %v100_v63 = vld [vmem:[#allocation5 + $0x108] sm:$0xff]  ;;  %v844_v2 = vpack.c.bf16 %v186_v59, %v184_v57  ;;  %v183_v3 = vld [vmem:[#allocation5 + $0x3a0] sm:$0xff] }
  0x55   :  { %v185_v4 = vld [vmem:[#allocation5 + $0x3b0] sm:$0xff]  ;;  %v758_v6 = vpack.c.bf16 %v97_v62, %v95_v61  ;;  %v190_v7 = vld [vmem:[#allocation5 + $0x3d8] sm:$0xff]  ;;  %v99_v9 = vld [vmem:[#allocation5 + $0x100] sm:$0xff] }
  0x56   :  { %747 = vmatpush1.bf16.msra.mxu1 %v746_v34  ;;  %v101_v10 = vld [vmem:[#allocation5 + $0x110] sm:$0xff]  ;;  %v104_v11 = vld [vmem:[#allocation5 + $0x128] sm:$0xff]  ;;  %v106_v12 = vld [vmem:[#allocation5 + $0x138] sm:$0xff]  ;;  %v846_v13 = vpack.c.bf16 %v185_v4, %v183_v3 }
  0x57   :  { %823 = vmatpush1.bf16.msra.mxu0 %v822_v0  ;;  %749 = vmatprep.subr.bf16.mxu1 %v748_v36  ;;  %v102_v0 = vld [vmem:[#allocation5 + $0x118] sm:$0xff]  ;;  %v189_v16 = vld [vmem:[#allocation5 + $0x3d0] sm:$0xff]  ;;  %v192_v17 = vld [vmem:[#allocation5 + $0x3e8] sm:$0xff]  ;;  %v764_v20 = vpack.c.bf16 %v106_v12, %v104_v11 }
  0x58   :  { %825 = vmatprep.subr.bf16.mxu0 %v824_v5  ;;  %v188_v5 = vld [vmem:[#allocation5 + $0x3c8] sm:$0xff]  ;;  %v760_v8 = vpack.c.bf16 %v102_v0, %v100_v63  ;;  %v194_v19 = vld [vmem:[#allocation5 + $0x3f8] sm:$0xff]  ;;  %v103_v21 = vld [vmem:[#allocation5 + $0x120] sm:$0xff] }
  0x59   :  { %v848_v14 = vpack.c.bf16 %v190_v7, %v188_v5  ;;  %v105_v22 = vld [vmem:[#allocation5 + $0x130] sm:$0xff]  ;;  %v108_v23 = vld [vmem:[#allocation5 + $0x148] sm:$0xff]  ;;  %v110_v24 = vld [vmem:[#allocation5 + $0x158] sm:$0xff]  ;;  %v852_v26 = vpack.c.bf16 %v194_v19, %v192_v17 }
  0x5a   :  { %751 = vmatpush1.bf16.msra.mxu1 %v750_v46  ;;  %v191_v27 = vld [vmem:[#allocation5 + $0x3e0] sm:$0xff]  ;;  %v193_v28 = vld [vmem:[#allocation5 + $0x3f0] sm:$0xff]  ;;  %v198_v31 = vld [vmem:[#allocation5 + $0x418] sm:$0xff]  ;;  %v768_v32 = vpack.c.bf16 %v110_v24, %v108_v23 }
  0x5b   :  { %827 = vmatpush1.bf16.msra.mxu0 %v826_v15  ;;  %753 = vmatprep.subr.bf16.mxu1 %v752_v48  ;;  %v187_v15 = vld [vmem:[#allocation5 + $0x3c0] sm:$0xff]  ;;  %v109_v34 = vld [vmem:[#allocation5 + $0x150] sm:$0xff]  ;;  %v112_v35 = vld [vmem:[#allocation5 + $0x168] sm:$0xff]  ;;  %v854_v37 = vpack.c.bf16 %v193_v28, %v191_v27 }
  0x5c   :  { %829 = vmatprep.subr.bf16.mxu0 %v828_v18  ;;  %v762_v18 = vpack.c.bf16 %v101_v10, %v99_v9  ;;  %v850_v25 = vpack.c.bf16 %v189_v16, %v187_v15  ;;  %v107_v33 = vld [vmem:[#allocation5 + $0x140] sm:$0xff]  ;;  %v114_v36 = vld [vmem:[#allocation5 + $0x178] sm:$0xff]  ;;  %v197_v40 = vld [vmem:[#allocation5 + $0x410] sm:$0xff] }
  0x5d   :  { %v195_v39 = vld [vmem:[#allocation5 + $0x400] sm:$0xff]  ;;  %v202_v43 = vld [vmem:[#allocation5 + $0x438] sm:$0xff]  ;;  %v772_v44 = vpack.c.bf16 %v114_v36, %v112_v35  ;;  %v113_v46 = vld [vmem:[#allocation5 + $0x170] sm:$0xff] }
  0x5e   :  { %755 = vmatpush1.bf16.msra.mxu1 %v754_v58  ;;  %v111_v45 = vld [vmem:[#allocation5 + $0x160] sm:$0xff]  ;;  %v116_v47 = vld [vmem:[#allocation5 + $0x188] sm:$0xff]  ;;  %v118_v48 = vld [vmem:[#allocation5 + $0x198] sm:$0xff]  ;;  %v858_v51 = vpack.c.bf16 %v197_v40, %v195_v39 }
  0x5f   :  { %831 = vmatpush1.bf16.msra.mxu0 %v830_v29  ;;  %757 = vmatprep.subr.bf16.mxu1 %v756_v60  ;;  %v196_v29 = vld [vmem:[#allocation5 + $0x408] sm:$0xff]  ;;  %v61_v49 = vld [vmem:[#allocation2 + $0x8] sm:$0xff]  ;;  %v62_v50 = vld [vmem:[#allocation2 + $0x10] sm:$0xff]  ;;  %v774_v57 = vpack.c.bf16 %v113_v46, %v111_v45  ;;  %v776_v58 = vpack.c.bf16 %v118_v48, %v116_v47 }
  0x60   :  { %833 = vmatprep.subr.bf16.mxu0 %v832_v30  ;;  %v766_v30 = vpack.c.bf16 %v105_v22, %v103_v21  ;;  %v856_v38 = vpack.c.bf16 %v198_v31, %v196_v29  ;;  %v199_v52 = vld [vmem:[#allocation5 + $0x420] sm:$0xff]  ;;  %343 = vmatprep.mubr.f32.mxu1 %v61_v49  ;;  %v204_v55 = vld [vmem:[#allocation5 + $0x448] sm:$0xff]  ;;  %v206_v56 = vld [vmem:[#allocation5 + $0x458] sm:$0xff] }
  0x61   :  { %v115_v59 = vld [vmem:[#allocation5 + $0x180] sm:$0xff]  ;;  %v117_v60 = vld [vmem:[#allocation5 + $0x190] sm:$0xff]  ;;  %v120_v62 = vld [vmem:[#allocation5 + $0x1a8] sm:$0xff] }
  0x62   :  { %759 = vmatpush1.bf16.msra.mxu1 %v758_v6  ;;  %v65_v61 = vld [vmem:[#allocation2 + $0x28] sm:$0xff]  ;;  %v122_v63 = vld [vmem:[#allocation5 + $0x1b8] sm:$0xff]  ;;  %v208_v4 = vld [vmem:[#allocation5 + $0x468] sm:$0xff]  ;;  %v778_v5 = vpack.c.bf16 %v117_v60, %v115_v59 }
  0x63   :  { %835 = vmatpush1.bf16.msra.mxu0 %v834_v41  ;;  %761 = vmatprep.subr.bf16.mxu1 %v760_v8  ;;  %v200_v41 = vld [vmem:[#allocation5 + $0x428] sm:$0xff]  ;;  %v205_v3 = vld [vmem:[#allocation5 + $0x450] sm:$0xff]  ;;  %v210_v6 = vld [vmem:[#allocation5 + $0x478] sm:$0xff]  ;;  %v780_v7 = vpack.c.bf16 %v122_v63, %v120_v62 }
  0x64   :  { %837 = vmatprep.subr.bf16.mxu0 %v836_v42  ;;  %v770_v42 = vpack.c.bf16 %v109_v34, %v107_v33  ;;  %v119_v8 = vld [vmem:[#allocation5 + $0x1a0] sm:$0xff]  ;;  %v121_v9 = vld [vmem:[#allocation5 + $0x1b0] sm:$0xff]  ;;  %v124_v10 = vld [vmem:[#allocation5 + $0x1c8] sm:$0xff] }
  0x65   :  { %v126_v11 = vld [vmem:[#allocation5 + $0x1d8] sm:$0xff]  ;;  %v209_v15 = vld [vmem:[#allocation5 + $0x470] sm:$0xff]  ;;  %v212_v16 = vld [vmem:[#allocation5 + $0x488] sm:$0xff]  ;;  %v782_v17 = vpack.c.bf16 %v121_v9, %v119_v8 }
  0x66   :  { %763 = vmatpush1.bf16.msra.mxu1 %v762_v18  ;;  %v214_v18 = vld [vmem:[#allocation5 + $0x498] sm:$0xff]  ;;  %v784_v19 = vpack.c.bf16 %v126_v11, %v124_v10  ;;  %v125_v21 = vld [vmem:[#allocation5 + $0x1d0] sm:$0xff]  ;;  %v128_v22 = vld [vmem:[#allocation5 + $0x1e8] sm:$0xff] }
  0x67   :  { %839 = vmatpush1.bf16.msra.mxu0 %v838_v53  ;;  %765 = vmatprep.subr.bf16.mxu1 %v764_v20  ;;  %v860_v53 = vpack.c.bf16 %v202_v43, %v200_v41  ;;  %v123_v20 = vld [vmem:[#allocation5 + $0x1c0] sm:$0xff]  ;;  %v130_v23 = vld [vmem:[#allocation5 + $0x1f8] sm:$0xff]  ;;  %v213_v27 = vld [vmem:[#allocation5 + $0x490] sm:$0xff] }
  0x68   :  { %841 = vmatprep.subr.bf16.mxu0 %v840_v54  ;;  %v201_v54 = vld [vmem:[#allocation5 + $0x430] sm:$0xff]  ;;  %v216_v28 = vld [vmem:[#allocation5 + $0x4a8] sm:$0xff]  ;;  %v786_v29 = vpack.c.bf16 %v125_v21, %v123_v20  ;;  %v788_v31 = vpack.c.bf16 %v130_v23, %v128_v22  ;;  %v262_v35 = vld [vmem:[#allocation5 + $0x618] sm:$0xff] }
  0x69   :  { %v862_v0 = vpack.c.bf16 %v201_v54, %v199_v52  ;;  %v129_v33 = vld [vmem:[#allocation5 + $0x1f0] sm:$0xff]  ;;  %v260_v34 = vld [vmem:[#allocation5 + $0x608] sm:$0xff]  ;;  %v581_v46 = vld [vmem:[#allocation7 + $0x80] sm:$0xff] }
  0x6a   :  { %767 = vmatpush1.bf16.msra.mxu1 %v766_v30  ;;  %v218_v30 = vld [vmem:[#allocation5 + $0x4b8] sm:$0xff]  ;;  %v217_v39 = vld [vmem:[#allocation5 + $0x4b0] sm:$0xff]  ;;  %v220_v40 = vld [vmem:[#allocation5 + $0x4c8] sm:$0xff]  ;;  %v920_v43 = vpack.c.bf16 %v262_v35, %v260_v34 }
  0x6b   :  { %843 = vmatpush1.bf16.msra.mxu0 %v842_v1  ;;  %769 = vmatprep.subr.bf16.mxu1 %v768_v32  ;;  %v864_v1 = vpack.c.bf16 %v206_v56, %v204_v55  ;;  %v127_v32 = vld [vmem:[#allocation5 + $0x1e0] sm:$0xff]  ;;  %v261_v45 = vld [vmem:[#allocation5 + $0x610] sm:$0xff]  ;;  %v582_v47 = vld [vmem:[#allocation7 + $0x88] sm:$0xff] }
  0x6c   :  { %845 = vmatprep.subr.bf16.mxu0 %v844_v2  ;;  %v203_v2 = vld [vmem:[#allocation5 + $0x440] sm:$0xff]  ;;  %v790_v41 = vpack.c.bf16 %v129_v33, %v127_v32  ;;  %v224_v52 = vld [vmem:[#allocation5 + $0x4e8] sm:$0xff]  ;;  %v226_v55 = vld [vmem:[#allocation5 + $0x4f8] sm:$0xff]  ;;  %v924_v56 = vpack.c.bf16 %v582_v47, %v581_v46 }
  0x6d   :  { %v866_v12 = vpack.c.bf16 %v205_v3, %v203_v2  ;;  %v219_v49 = vld [vmem:[#allocation5 + $0x4c0] sm:$0xff]  ;;  %v583_v59 = vld [vmem:[#allocation7 + $0x90] sm:$0xff]  ;;  %v584_v60 = vld [vmem:[#allocation7 + $0x98] sm:$0xff]  ;;  %v884_v63 = vpack.c.bf16 %v226_v55, %v224_v52 }
  0x6e   :  { %771 = vmatpush1.bf16.msra.mxu1 %v770_v42  ;;  %v222_v42 = vld [vmem:[#allocation5 + $0x4d8] sm:$0xff]  ;;  %v223_v62 = vld [vmem:[#allocation5 + $0x4e0] sm:$0xff]  ;;  %v586_v10 = vld [vmem:[#allocation7 + $0xa8] sm:$0xff] }
  0x6f   :  { %847 = vmatpush1.bf16.msra.mxu0 %v846_v13  ;;  %773 = vmatprep.subr.bf16.mxu1 %v772_v44  ;;  %v868_v13 = vpack.c.bf16 %v210_v6, %v208_v4  ;;  %v259_v44 = vld [vmem:[#allocation5 + $0x600] sm:$0xff]  ;;  %v66_v2 = vld [vmem:[#allocation2 + $0x30] sm:$0xff]  ;;  %v928_v6 = vpack.c.bf16 %v584_v60, %v583_v59  ;;  %v570_v20 = vld [vmem:[#allocation7 + $0x28] sm:$0xff] }
  0x70   :  { %849 = vmatprep.subr.bf16.mxu0 %v848_v14  ;;  %v207_v14 = vld [vmem:[#allocation5 + $0x460] sm:$0xff]  ;;  %v922_v54 = vpack.c.bf16 %v261_v45, %v259_v44  ;;  %v230_v4 = vld [vmem:[#allocation5 + $0x518] sm:$0xff]  ;;  %v587_v21 = vld [vmem:[#allocation7 + $0xb0] sm:$0xff] }
  0x71   :  { %v870_v24 = vpack.c.bf16 %v209_v15, %v207_v14  ;;  %v568_v8 = vld [vmem:[#allocation7 + $0x18] sm:$0xff]  ;;  %v585_v9 = vld [vmem:[#allocation7 + $0xa0] sm:$0xff]  ;;  %v229_v14 = vld [vmem:[#allocation5 + $0x510] sm:$0xff] }
  0x72   :  { %775 = vmatpush1.bf16.msra.mxu1 %v774_v57  ;;  %v565_v57 = vld [vmem:[#allocation7] sm:$0xff]  ;;  %v232_v15 = vld [vmem:[#allocation5 + $0x528] sm:$0xff]  ;;  %v588_v22 = vld [vmem:[#allocation7 + $0xb8] sm:$0xff] }
  0x73   :  { %851 = vmatpush1.bf16.msra.mxu0 %v850_v25  ;;  %777 = vmatprep.subr.bf16.mxu1 %v776_v58  ;;  %v872_v25 = vpack.c.bf16 %v214_v18, %v212_v16  ;;  %v566_v58 = vld [vmem:[#allocation7 + $0x8] sm:$0xff]  ;;  %v932_v18 = vpack.c.bf16 %v586_v10, %v585_v9  ;;  %v572_v32 = vld [vmem:[#allocation7 + $0x38] sm:$0xff]  ;;  %v589_v33 = vld [vmem:[#allocation7 + $0xc0] sm:$0xff] }
  0x74   :  { %853 = vmatprep.subr.bf16.mxu0 %v852_v26  ;;  %v211_v26 = vld [vmem:[#allocation5 + $0x480] sm:$0xff]  ;;  %v926_v3 = vpack.c.bf16 %v566_v58, %v565_v57  ;;  %v590_v34 = vld [vmem:[#allocation7 + $0xc8] sm:$0xff]  ;;  %v245_v55 = vld [vmem:[#allocation5 + $0x590] sm:$0xff] }
  0x75   :  { %v874_v36 = vpack.c.bf16 %v213_v27, %v211_v26  ;;  %v233_v26 = vld [vmem:[#allocation5 + $0x530] sm:$0xff]  ;;  %v236_v27 = vld [vmem:[#allocation5 + $0x548] sm:$0xff]  ;;  %v239_v47 = vld [vmem:[#allocation5 + $0x560] sm:$0xff] }
  0x76   :  { %779 = vmatpush1.bf16.msra.mxu1 %v778_v5  ;;  %v1074_v5 = vmov 0.0   ;;  %v574_v44 = vld [vmem:[#allocation7 + $0x48] sm:$0xff]  ;;  %v250_v57 = vld [vmem:[#allocation5 + $0x5b8] sm:$0xff]  ;;  %v247_v60 = vld [vmem:[#allocation5 + $0x5a0] sm:$0xff] }
  0x77   :  { %855 = vmatpush1.bf16.msra.mxu0 %v854_v37  ;;  %781 = vmatprep.subr.bf16.mxu1 %v780_v7  ;;  %v876_v37 = vpack.c.bf16 %v218_v30, %v216_v28  ;;  %v567_v7 = vld [vmem:[#allocation7 + $0x10] sm:$0xff]  ;;  %v936_v30 = vpack.c.bf16 %v588_v22, %v587_v21  ;;  %v577_v21 = vld [vmem:[#allocation7 + $0x60] sm:$0xff]  ;;  %v578_v22 = vld [vmem:[#allocation7 + $0x68] sm:$0xff] }
  0x78   :  { %857 = vmatprep.subr.bf16.mxu0 %v856_v38  ;;  %v215_v38 = vld [vmem:[#allocation5 + $0x4a0] sm:$0xff]  ;;  %v930_v16 = vpack.c.bf16 %v568_v8, %v567_v7  ;;  %v257_v9 = vld [vmem:[#allocation5 + $0x5f0] sm:$0xff] }
  0x79   :  { %v878_v48 = vpack.c.bf16 %v217_v39, %v215_v38  ;;  %v237_v38 = vld [vmem:[#allocation5 + $0x550] sm:$0xff]  ;;  %v240_v39 = vld [vmem:[#allocation5 + $0x568] sm:$0xff]  ;;  %v255_v8 = vld [vmem:[#allocation5 + $0x5e0] sm:$0xff] }
  0x7a   :  { %415 = vmatmul.mubr.f32.vlgmr.msra.gmra.mrb[0].mxu0 %v62_v50  ;;  %783 = vmatpush1.bf16.msra.mxu1 %v782_v17  ;;  %v880_v50 = vpack.c.bf16 %v222_v42, %v220_v40  ;;  %v234_v17 = vld [vmem:[#allocation5 + $0x538] sm:$0xff]  ;;  %v940_v42 = vpack.c.bf16 %v590_v34, %v589_v33  ;;  %v918_v10 = vpack.c.bf16 %v257_v9, %v255_v8  ;;  %v265_v34 = vlaneseq }
  0x7b   :  { %859 = vmatpush1.bf16.msra.mxu0 %v858_v51  ;;  %485 = vmatprep.mubr.f32.mxu0 %v65_v61  ;;  %v221_v51 = vld [vmem:[#allocation5 + $0x4d0] sm:$0xff] }
  0x7c   :  { %861 = vmatprep.subr.bf16.mxu0 %v860_v53  ;;  %785 = vmatprep.subr.bf16.mxu1 %v784_v19  ;;  %v60_v53 = vld [vmem:[#allocation2] sm:$0xff]  ;;  %v882_v61 = vpack.c.bf16 %v221_v51, %v219_v49  ;;  %v569_v19 = vld [vmem:[#allocation7 + $0x20] sm:$0xff]  ;;  %v246_v51 = vld [vmem:[#allocation5 + $0x598] sm:$0xff] }
  0x7d   :  { %v934_v28 = vpack.c.bf16 %v570_v20, %v569_v19  ;;  %v594_v19 = vld [vmem:[#allocation7 + $0xe8] sm:$0xff] }
  0x7e   :  { %787 = vmatpush1.bf16.msra.mxu1 %v786_v29  ;;  %v238_v29 = vld [vmem:[#allocation5 + $0x558] sm:$0xff] }
  0x7f   :  { %863 = vmatpush1.bf16.msra.mxu0 %v862_v0  ;;  %789 = vmatprep.subr.bf16.mxu1 %v788_v31  ;;  %v225_v0 = vld [vmem:[#allocation5 + $0x4f0] sm:$0xff] }
  0x80   :  { %865 = vmatprep.subr.bf16.mxu0 %v864_v1  ;;  %v228_v1 = vld [vmem:[#allocation5 + $0x508] sm:$0xff]  ;;  %v886_v11 = vpack.c.bf16 %v225_v0, %v223_v62  ;;  %v571_v31 = vld [vmem:[#allocation7 + $0x30] sm:$0xff] }
  0x81   :  { %v938_v40 = vpack.c.bf16 %v572_v32, %v571_v31  ;;  %v252_v62 = vld [vmem:[#allocation5 + $0x5c8] sm:$0xff] }
  0x82   :  { %791 = vmatpush1.bf16.msra.mxu1 %v790_v41  ;;  %v242_v41 = vld [vmem:[#allocation5 + $0x578] sm:$0xff] }
  0x83   :  { %867 = vmatpush1.bf16.msra.mxu0 %v866_v12  ;;  %921 = vmatprep.subr.bf16.mxu1 %v920_v43  ;;  %v888_v12 = vpack.c.bf16 %v230_v4, %v228_v1  ;;  %v573_v43 = vld [vmem:[#allocation7 + $0x40] sm:$0xff]  ;;  %v900_v46 = vpack.c.bf16 %v242_v41, %v240_v39  ;;  %v256_v4 = vld [vmem:[#allocation5 + $0x5e8] sm:$0xff] }
  0x84   :  { %869 = vmatprep.subr.bf16.mxu0 %v868_v13  ;;  %v227_v13 = vld [vmem:[#allocation5 + $0x500] sm:$0xff]  ;;  %v942_v49 = vpack.c.bf16 %v574_v44, %v573_v43 }
  0x85   :  { %344 = vmatmul.mubr.f32.vlgmr.msra.gmra.mrb[0].mxu1 %v60_v53  ;;  %v890_v23 = vpack.c.bf16 %v229_v14, %v227_v13  ;;  %v592_v13 = vld [vmem:[#allocation7 + $0xd8] sm:$0xff] }
  0x86   :  { %923 = vmatpush1.bf16.msra.mxu1 %v922_v54  ;;  %556 = vmatprep.mubr.f32.mxu1 %v1074_v5  ;;  %v243_v54 = vld [vmem:[#allocation5 + $0x580] sm:$0xff]  ;;  %v258_v5 = vld [vmem:[#allocation5 + $0x5f8] sm:$0xff] }
  0x87   :  { %871 = vmatpush1.bf16.msra.mxu0 %v870_v24  ;;  %925 = vmatprep.subr.bf16.mxu1 %v924_v56  ;;  %v892_v24 = vpack.c.bf16 %v234_v17, %v232_v15  ;;  %v248_v56 = vld [vmem:[#allocation5 + $0x5a8] sm:$0xff]  ;;  %v906_v58 = vpack.c.bf16 %v245_v55, %v243_v54  ;;  %v916_v7 = vpack.c.bf16 %v258_v5, %v256_v4  ;;  %v575_v15 = vld [vmem:[#allocation7 + $0x50] sm:$0xff] }
  0x88   :  { %873 = vmatprep.subr.bf16.mxu0 %v872_v25  ;;  %v231_v25 = vld [vmem:[#allocation5 + $0x520] sm:$0xff]  ;;  %v908_v59 = vpack.c.bf16 %v250_v57, %v248_v56 }
  0x89   :  { %691 = vmatmul.mubr.msk.f32.vlgmr.msra.gmra.mrb[2].mxu1 %vm275_vm0, %v66_v2  ;;  %v894_v35 = vpack.c.bf16 %v233_v26, %v231_v25  ;;  %v251_v2 = vld [vmem:[#allocation5 + $0x5c0] sm:$0xff]  ;;  %v596_v25 = vld [vmem:[#allocation7 + $0xf8] sm:$0xff] }
  0x8a   :  { %927 = vmatpush3.bf16.msra.mxu1 %v926_v3  ;;  %v253_v3 = vld [vmem:[#allocation5 + $0x5d0] sm:$0xff] }
  0x8b   :  { %875 = vmatpush1.bf16.msra.mxu0 %v874_v36  ;;  %929 = vmatprep.subr.bf16.mxu1 %v928_v6  ;;  %v896_v36 = vpack.c.bf16 %v238_v29, %v236_v27  ;;  %v914_v6 = vpack.c.bf16 %v253_v3, %v251_v2  ;;  %v579_v27 = vld [vmem:[#allocation7 + $0x70] sm:$0xff] }
  0x8c   :  { %877 = vmatprep.subr.bf16.mxu0 %v876_v37  ;;  %v235_v37 = vld [vmem:[#allocation5 + $0x540] sm:$0xff] }
  0x8d   :  { %v898_v45 = vpack.c.bf16 %v237_v38, %v235_v37  ;;  %v263_v37 = vld [vmem:[%s1162_s2] sm:$0x3]  ;;  %s1075_s2 = smov [#allocation8]  }
  0x8e   :  { %931 = vmatpush3.bf16.msra.mxu1 %v930_v16  ;;  %v576_v16 = vld [vmem:[#allocation7 + $0x58] sm:$0xff]  ;;  %s681_s9 = sshll.u32 %s1075_s2, 4  ;;  %s682_s9 = int_to_ptr.vmem [resolvable:$true] %s681_s9 }
  0x8f   :  { %879 = vmatpush1.bf16.msra.mxu0 %v878_v48  ;;  %933 = vmatprep.subr.bf16.mxu1 %v932_v18  ;;  %v241_v48 = vld [vmem:[#allocation5 + $0x570] sm:$0xff]  ;;  %v946_v17 = vpack.c.bf16 %v576_v16, %v575_v15  ;;  %v593_v18 = vld [vmem:[#allocation7 + $0xe0] sm:$0xff]  ;;  %s1039_s10 = scalar_lea.vmem %s682_s9, 128  ;;  %p1044_p11 = scmp.lt.s32.totalorder %s682_s9, %s682_s9 }
  0x90   :  { %881 = vmatprep.subr.bf16.mxu0 %v880_v50  ;;  %v244_v50 = vld [vmem:[#allocation5 + $0x588] sm:$0xff]  ;;  %v902_v52 = vpack.c.bf16 %v241_v48, %v239_v47  ;;  %v948_v20 = vpack.c.bf16 %v594_v19, %v593_v18  ;;  %p1040_p10 = scmp.ne.s32.totalorder %s682_s9, %s1039_s10  ;;  %p1045_p12 = scmp.lt.s32.totalorder %s1039_s10, %s1039_s10 }
  0x91   :  { %v904_v53 = vpack.c.bf16 %v246_v51, %v244_v50 }
  0x92   :  { %935 = vmatpush3.bf16.msra.mxu1 %v934_v28  ;;  %v580_v28 = vld [vmem:[#allocation7 + $0x78] sm:$0xff]  ;;  %p1046_p13 = por %p1045_p12, %p1044_p11 }
  0x93   :  { %883 = vmatpush1.bf16.msra.mxu0 %v882_v61  ;;  %937 = vmatprep.subr.bf16.mxu1 %v936_v30  ;;  %v249_v61 = vld [vmem:[#allocation5 + $0x5b0] sm:$0xff]  ;;  %v954_v29 = vpack.c.bf16 %v580_v28, %v579_v27 }
  0x94   :  { %885 = vmatprep.subr.bf16.mxu0 %v884_v63  ;;  %v254_v63 = vld [vmem:[#allocation5 + $0x5d8] sm:$0xff]  ;;  %v910_v0 = vpack.c.bf16 %v249_v61, %v247_v60  ;;  %p1047_p0 = pnand %p1046_p13, %p1040_p10 }
  0x95   :  { %v912_v1 = vpack.c.bf16 %v254_v63, %v252_v62 }
  0x96   :  { %939 = vmatpush3.bf16.msra.mxu1 %v938_v40 }
  0x97   :  { %887 = vmatpush1.bf16.msra.mxu0 %v886_v11  ;;  %941 = vmatprep.subr.bf16.mxu1 %v940_v42  ;;  %v64_v11 = vld [vmem:[#allocation2 + $0x20] sm:$0xff] }
  0x98   :  { %889 = vmatprep.subr.bf16.mxu0 %v888_v12  ;;  %v591_v12 = vld [vmem:[#allocation7 + $0xd0] sm:$0xff] }
  0x99   :  { %v944_v14 = vpack.c.bf16 %v592_v13, %v591_v12 }
  0x9a   :  { %943 = vmatpush3.bf16.msra.mxu1 %v942_v49 }
  0x9b   :  { %891 = vmatpush1.bf16.msra.mxu0 %v890_v23  ;;  %945 = vmatprep.subr.bf16.mxu1 %v944_v14  ;;  %v950_v23 = vpack.c.bf16 %v578_v22, %v577_v21 }
  0x9c   :  { %893 = vmatprep.subr.bf16.mxu0 %v892_v24  ;;  %v595_v24 = vld [vmem:[#allocation7 + $0xf0] sm:$0xff] }
  0x9d   :  { %v952_v26 = vpack.c.bf16 %v596_v25, %v595_v24 }
  0x9e   :  { %947 = vmatpush3.bf16.msra.mxu1 %v946_v17 }
  0x9f   :  { %895 = vmatpush1.bf16.msra.mxu0 %v894_v35  ;;  %949 = vmatprep.subr.bf16.mxu1 %v948_v20  ;;  %v266_v35 = vshrl.u32 %v265_v34, 7 }
  0xa0   :  { %897 = vmatprep.subr.bf16.mxu0 %v896_v36 }
  0xa1   :  { %v267_v36 = vsub.s32 0, %v266_v35  ;;  %v271_v38 = vsub.s32 1, %v266_v35 }
  0xa2   :  { %951 = vmatpush3.bf16.msra.mxu1 %v950_v23 }
  0xa3   :  { %899 = vmatpush1.bf16.msra.mxu0 %v898_v45  ;;  %953 = vmatprep.subr.bf16.mxu1 %v952_v26  ;;  %v268_v39 = vrot.slane %v263_v37, %v267_v36  ;;  %v272_v40 = vrot.slane %v263_v37, %v271_v38 }
  0xa4   :  { %901 = vmatprep.subr.bf16.mxu0 %v900_v46 }
  0xa6   :  { %955 = vmatpush3.bf16.msra.mxu1 %v954_v29 }
  0xa7   :  { %903 = vmatpush1.bf16.msra.mxu0 %v902_v52  ;;  %v692_v52 = vld [vmem:[%s1164_s4] ss:$0 sm:$0xff] }
  0xa8   :  { %905 = vmatprep.subr.bf16.mxu0 %v904_v53 }
  0xab   :  { %907 = vmatpush1.bf16.msra.mxu0 %v906_v58 }
  0xac   :  { %909 = vmatprep.subr.bf16.mxu0 %v908_v59 }
  0xaf   :  { %911 = vmatpush1.bf16.msra.mxu0 %v910_v0 }
  0xb0   :  { %913 = vmatprep.subr.bf16.mxu0 %v912_v1 }
  0xb3   :  { %915 = vmatpush1.bf16.msra.mxu0 %v914_v6 }
  0xb4   :  { %917 = vmatprep.subr.bf16.mxu0 %v916_v7 }
  0xb7   :  { %919 = vmatpush1.bf16.msra.mxu0 %v918_v10 }
  0xba   :  { %486 = vmatmul.mubr.f32.vlgmr.msra.gmra.mrb[0].mxu0 %v64_v11 }
 0x158   :  { %v345_v30 = vpop.f32.mrb[0].mxu1 }
 0x159   :  { %v347_v31 = vpop.f32.mrb[1].mxu1  ;;  %v346_v41 = vadd.f32 %v345_v30, %v268_v39 }
 0x15a   :  { %v348_v42 = vadd.f32 %v347_v31, %v272_v40 }
 0x15c   :  { %v558_v32 = vpop.f32.mrb[2].mxu1 }
 0x15d   :  { %v560_v33 = vpop.f32.mrb[3].mxu1 }
 0x18d   :  { %v487_v43 = vpop.f32.mrb[0].mxu0 }
 0x18e   :  { %v957_v44 = vadd.f32 %v487_v43, %v346_v41  ;;  %v489_v45 = vpop.f32.mrb[1].mxu0 }
 0x18f   :  { %v960_v46 = vadd.f32 %v489_v45, %v348_v42 }
 0x190   :  { %v958_v47 = vadd.f32 %v957_v44, %v558_v32 }
 0x191   :  { %v961_v48 = vadd.f32 %v960_v46, %v560_v33 }
 0x192   :  { %v563_v50 = vmax.f32 %v958_v47, 0.0 }
 0x193   :  { %v564_v49 = vmax.f32 %v961_v48, 0.0 }
 0x195   :  { %668 = vmatprep.mubr.f32.mxu1 %v564_v49 }
 0x196   :  { %669 = vmatmul.mubr.f32.vlgmr.msra.gmra.mrb[4].mxu1 %v563_v50 }
 0x269   :  { %v725_v51 = vpop.f32.mrb[4].mxu1 }
 0x26a   :  { %v726_v53 = vpop.f32.mrb[5].mxu1 }
 0x26b   :  { %v727_v54 = vadd.f32 %v726_v53, %v725_v51 }
 0x26d   :  { %v671_v55 = vadd.f32 %v727_v54, %v692_v52 }
 0x26f   :  { %674 = vst [vmem:[#allocation8] sm:$0xff] %v671_v55 }
 0x270   :  { %1050 = shalt.err (!%p1047_p0)
}
 0x271   :  { %s1051_s13 = scalar_lea.hbm %s1165_s5, 128 }
 0x272   :  { %p1052_p1 = scmp.ne.s32.totalorder %s1165_s5, %s1051_s13  ;;  %p1055_p2 = scmp.lt.u32.totalorder %s1051_s13, %s1165_s5 }
 0x274   :  { %p1057_p3 = pnand %p1055_p2, %p1052_p1 }
 0x276   :  { %1060 = shalt.err (!%p1057_p3)
}
 0x277   :  { %684 = dma.vmem_to_hbm [thread:$0]  %s682_s9, 128, %s1165_s5, [#allocation4]  }
 0x278   :  { %1065 = dma.done.wait [#allocation4], 128  }
 0x279   :  { %1066 = vsyncadd [#allocation4], 4294967168 }
 0x27a   :  { %688 = vsyncpa [#allocation3], 1 }
 0x27b   :  { %689 = vsyncpa [#allocation6], 1 }
 0x27c   :  { %690 = vsyncpa [#allocation4], 1 }

</bundles_post_ra>
